<compile_context>
chip_gen: v7x
topology: tpu7x:2x2x1
jax: 0.10.0
libtpu: 0.0.40
codegen_flags: <defaults>
</compile_context>

<pallas_src>
import functools

import jax
import jax.numpy as jnp
from jax.experimental import pallas as pl
from jax.experimental.pallas import tpu as pltpu


LANE = 128      # lane width: pad the class dim up to this for dense stores
SUBLANE = 8     # f32 sublane granularity


def _round_up(x, m):
    return ((x + m - 1) // m) * m


def _choose_tm(M, H, C_pad, itemsize, budget_bytes=12 * 1024 * 1024):
    """Pick an M-tile keeping double-buffered x + out tiles under budget."""
    # Resident (non-pipelined) weight + bias footprint; reserve 2x for slack.
    resident = (H * C_pad) * itemsize + C_pad * 4
    budget = max(budget_bytes - 2 * resident, 1 << 20)
    per_row = 2 * (H + C_pad) * itemsize        # 2x for double buffering
    tm = budget // max(per_row, 1)
    tm = max(SUBLANE, min(int(tm), 2048))
    tm = (tm // SUBLANE) * SUBLANE              # sublane-aligned
    tm = min(tm, _round_up(M, SUBLANE))         # don't exceed (padded) M
    return int(tm)


def _linear_kernel(x_ref, w_ref, b_ref, o_ref):
    # x_ref: (tm, H)  w_ref: (H, C_pad)  b_ref: (1, C_pad) f32  o_ref: (tm, C_pad)
    acc = jnp.dot(x_ref[...], w_ref[...], preferred_element_type=jnp.float32)
    o_ref[...] = (acc + b_ref[...]).astype(o_ref.dtype)


@jax.jit
def pooler_start_logits(hidden_states, weight, bias):
    """hidden_states: (B, S, H); weight: (C, H) [PyTorch layout]; bias: (C,)."""
    B, S, H = hidden_states.shape
    C = weight.shape[0]
    M = B * S
    C_pad = _round_up(C, LANE)
    dtype = hidden_states.dtype
    itemsize = jnp.dtype(dtype).itemsize

    x2d = hidden_states.reshape(M, H)                                  # (M, H)
    # One small XLA transpose+pad per call; keeps the kernel's weight tile in
    # MXU-native (K, N) layout so nothing is re-laid-out per grid step.
    w_kn = jnp.pad(weight, ((0, C_pad - C), (0, 0))).T.astype(dtype)   # (H, C_pad)
    b_pad = jnp.pad(bias.astype(jnp.float32),
                    (0, C_pad - C)).reshape(1, C_pad)                  # (1, C_pad)

    tm = _choose_tm(M, H, C_pad, itemsize)
    grid = (pl.cdiv(M, tm),)

    cost = pl.CostEstimate(
        flops=2 * M * H * C_pad,
        transcendentals=0,
        bytes_accessed=(M * H * itemsize
                        + H * C_pad * itemsize
                        + C_pad * 4
                        + M * C_pad * itemsize),
    )

    out2d = pl.pallas_call(
        _linear_kernel,
        out_shape=jax.ShapeDtypeStruct((M, C_pad), dtype),
        grid_spec=pltpu.PrefetchScalarGridSpec(
            num_scalar_prefetch=0,
            grid=grid,
            in_specs=[
                pl.BlockSpec((tm, H), lambda i: (i, 0)),      # streamed x tiles
                pl.BlockSpec((H, C_pad), lambda i: (0, 0)),   # resident weight
                pl.BlockSpec((1, C_pad), lambda i: (0, 0)),   # resident bias
            ],
            out_specs=pl.BlockSpec((tm, C_pad), lambda i: (i, 0)),
        ),
        compiler_params=pltpu.CompilerParams(
            dimension_semantics=("parallel",)),
        cost_estimate=cost,
    )(x2d, w_kn, b_pad)

    return out2d[:, :C].reshape(B, S, C)


if __name__ == "__main__":
    # Small, deterministic shapes consistent with the module's forward.
    batch, seq, hidden, num_classes = 2, 8, 32, 4

    key = jax.random.PRNGKey(0)
    k_x, k_w, k_b = jax.random.split(key, 3)

    hidden_states = jax.random.normal(k_x, (batch, seq, hidden), dtype=jnp.float32)
    # Deterministic "parameter init" for nn.Linear(hidden, num_classes).
    weight = jax.random.normal(k_w, (num_classes, hidden), dtype=jnp.float32) * 0.02
    bias = jax.random.normal(k_b, (num_classes,), dtype=jnp.float32) * 0.02

    out = pooler_start_logits(hidden_states, weight, bias)
    out = jax.block_until_ready(out)

    # Reference check against plain JAX (same math as PyTorch's nn.Linear).
    ref = hidden_states @ weight.T + bias
    assert out.shape == (batch, seq, num_classes)
    assert jnp.allclose(out, ref, atol=1e-5, rtol=1e-5)

    print("KERNEL_OK")
</pallas_src>

<mosaic_0001>
module attributes {stable_mosaic.version = 11 : i64} {
  func.func @_linear_kernel(%arg0: i32, %arg1: memref<16x32xf32, #tpu.memory_space<vmem>>, %arg2: memref<32x128xf32, #tpu.memory_space<vmem>>, %arg3: memref<1x128xf32, #tpu.memory_space<vmem>>, %arg4: memref<16x128xf32, #tpu.memory_space<vmem>>) attributes {dimension_semantics = [#tpu.dimension_semantics<parallel>], iteration_bounds = array<i64: 1>, scalar_prefetch = 0 : i64, scratch_operands = 0 : i64, tpu.core_type = #tpu.core_type<tc>, window_params = [{transform_indices = @transform_0, window_bounds = array<i64: 16, 32>}, {pipeline_mode = #tpu.pipeline_mode<synchronous>, transform_indices = @transform_1, window_bounds = array<i64: 32, 128>}, {pipeline_mode = #tpu.pipeline_mode<synchronous>, transform_indices = @transform_2, window_bounds = array<i64: 1, 128>}, {transform_indices = @transform_3, window_bounds = array<i64: 16, 128>}]} {
    %c0 = arith.constant 0 : index
    %c0_0 = arith.constant 0 : index
    %0 = vector.load %arg1[%c0, %c0_0] : memref<16x32xf32, #tpu.memory_space<vmem>>, vector<16x32xf32>
    %c0_1 = arith.constant 0 : index
    %c0_2 = arith.constant 0 : index
    %1 = vector.load %arg2[%c0_1, %c0_2] : memref<32x128xf32, #tpu.memory_space<vmem>>, vector<32x128xf32>
    %cst = arith.constant dense<0.000000e+00> : vector<16x128xf32>
    %2 = tpu.matmul %0, %1, %cst {dimension_numbers = #tpu.dot_dimension_numbers<[1], [0], [0], [1], [0, 0, 1, 1], [], []>} : vector<16x32xf32>, vector<32x128xf32>, vector<16x128xf32> -> vector<16x128xf32>
    %c0_3 = arith.constant 0 : index
    %c0_4 = arith.constant 0 : index
    %3 = vector.load %arg3[%c0_3, %c0_4] : memref<1x128xf32, #tpu.memory_space<vmem>>, vector<1x128xf32>
    %4 = vector.broadcast %3 : vector<1x128xf32> to vector<16x128xf32>
    %5 = arith.addf %2, %4 : vector<16x128xf32>
    %c0_5 = arith.constant 0 : index
    %c0_6 = arith.constant 0 : index
    %6 = vector.load %arg4[%c0_5, %c0_6] : memref<16x128xf32, #tpu.memory_space<vmem>>, vector<16x128xf32>
    tpu.vector_store %arg4[%c0_5, %c0_6], %5 {strides = array<i32>} : memref<16x128xf32, #tpu.memory_space<vmem>>, vector<16x128xf32>,
    return
  }
  func.func @transform_0(%arg0: i32) -> (i32, i32) {
    %c0_i32 = arith.constant 0 : i32
    %c0_i32_0 = arith.constant 0 : i32
    return %arg0, %c0_i32 : i32, i32
  }
  func.func @transform_1(%arg0: i32) -> (i32, i32) {
    %c0_i32 = arith.constant 0 : i32
    %c0_i32_0 = arith.constant 0 : i32
    %c0_i32_1 = arith.constant 0 : i32
    return %c0_i32, %c0_i32_0 : i32, i32
  }
  func.func @transform_2(%arg0: i32) -> (i32, i32) {
    %c0_i32 = arith.constant 0 : i32
    %c0_i32_0 = arith.constant 0 : i32
    %c0_i32_1 = arith.constant 0 : i32
    return %c0_i32, %c0_i32_0 : i32, i32
  }
  func.func @transform_3(%arg0: i32) -> (i32, i32) {
    %c0_i32 = arith.constant 0 : i32
    %c0_i32_0 = arith.constant 0 : i32
    return %arg0, %c0_i32 : i32, i32
  }
}

</mosaic_0001>

<bundles_post_ra>
// kernel: pooler_start_logits.1
= control target key start
LH: loop header
LB: loop body
LE: loop exit
PB: predicated region body
PF: predicated region fallthrough
CT: control target
= control target key end

     0   :  { %vm27_vm0 = vcmask 261120   ;;  %s190_s1 = inlined_call_operand.vmem [shape: f32[32,128], index: 1, kind: input, shape index: {}]   ;;  %s191_s0 = inlined_call_operand.vmem [shape: f32[16,32], index: 0, kind: input, shape index: {}]   ;;  %s192_s2 = inlined_call_operand.vmem [shape: f32[1,128], index: 2, kind: input, shape index: {}]   ;;  %s193_s3 = inlined_call_operand.vmem [shape: f32[16,128], index: 3, kind: output, shape index: {}]  }
   0x1   :  { %v16_v0 = vld [vmem:[%s190_s1] sm:$0xff]  ;;  %v17_v1 = vld [vmem:[%s190_s1 + $0x8] sm:$0xff]  ;;  %v18_v2 = vld [vmem:[%s190_s1 + $0x10] sm:$0xff] }
   0x2   :  { %v135_v3 = vpack.c.bf16 %v17_v1, %v16_v0  ;;  %v19_v4 = vld [vmem:[%s190_s1 + $0x18] sm:$0xff]  ;;  %v14_v5 = vld [vmem:[%s191_s0] sm:$0xff]  ;;  %v15_v7 = vld [vmem:[%s191_s0 + $0x8] sm:$0xff] }
   0x3   :  { %v139_v6 = vpack.c.bf16 %v19_v4, %v18_v2  ;;  %132 = vmatprep.mubr.msk.f32.mxu0 %vm27_vm0, %v14_v5  ;;  %v115_v8 = vld [vmem:[%s192_s2] ss:$0 sm:$0xff] }
   0x4   :  { %136 = vmatprep.subr.bf16.mxu0 %v135_v3 }
   0x5   :  { %138 = vmatpush3.bf16.msra.mxu0 %v135_v3 }
   0x6   :  { %140 = vmatprep.subr.bf16.mxu0 %v139_v6 }
   0x9   :  { %142 = vmatpush3.bf16.msra.mxu0 %v139_v6 }
   0xc   :  { %133 = vmatmul.mubr.msk.f32.vlgmr.msra.gmra.mrb[0].mxu0 %vm27_vm0, %v15_v7 }
  0xdf   :  { %v134_v9 = vpop.f32.mrb[0].mxu0 }
  0xe0   :  { %v106_v10 = vadd.f32 %v134_v9, %v115_v8  ;;  %v100_v11 = vpop.f32.mrb[1].mxu0 }
  0xe1   :  { %v101_v12 = vadd.f32 %v115_v8, %v100_v11 }
  0xe2   :  { %110 = vst [vmem:[%s193_s3 + $0x8] sm:$0xff] %v106_v10 }
  0xe3   :  { %109 = vst [vmem:[%s193_s3] sm:$0xff] %v101_v12 }

</bundles_post_ra>
